<compile_context>
chip_gen: v7x
topology: tpu7x:2x2x1
jax: 0.10.0
libtpu: 0.0.40
codegen_flags: <defaults>
</compile_context>

<pallas_src>
import jax
import jax.numpy as jnp
from jax import lax
from jax.experimental import pallas as pl
from jax.experimental.pallas import tpu as pltpu

DROPOUT_PROB = 0.4      # element-wise dropout prob
DROPOUT_2D_PROB = 0.2   # channel (2D) dropout prob

# Signed-int32 thresholds: with `bits` uniform over all 2^32 int32 values,
# keep an element iff bits >= T, where T = (p - 0.5) * 2^32  ==> P(keep) = 1 - p.
_THRESH_ELEM = int(round((DROPOUT_PROB - 0.5) * (1 << 32)))       # -429496730
_THRESH_CHAN = int(round((DROPOUT_2D_PROB - 0.5) * (1 << 32)))    # -1288490189

_SCALE_ELEM = 1.0 / (1.0 - DROPOUT_PROB)
_SCALE_CHAN = 1.0 / (1.0 - DROPOUT_2D_PROB)


def _mixdropout_kernel(mode_ref, x_ref, ebits_ref, cbits_ref, o_ref):
    # mode_ref: SMEM int32[1]; 0 -> element-wise dropout, 1 -> channel dropout
    mode = mode_ref[0]

    @pl.when(mode == 0)
    def _elementwise():
        keep = ebits_ref[...] >= _THRESH_ELEM                  # (tr, tl) bool
        scaled = x_ref[...] * _SCALE_ELEM
        o_ref[...] = jnp.where(keep, scaled, 0.0).astype(o_ref.dtype)

    @pl.when(mode != 0)
    def _channelwise():
        keep = cbits_ref[...] >= _THRESH_CHAN                  # (tr, 1) -> broadcast over lanes
        scaled = x_ref[...] * _SCALE_CHAN
        o_ref[...] = jnp.where(keep, scaled, 0.0).astype(o_ref.dtype)


def _round_up(x, m):
    return ((x + m - 1) // m) * m


def _pick_tile(padded_dim, candidates):
    for c in candidates:
        if padded_dim % c == 0:
            return c
    return padded_dim


def mix_dropout(x, key, training=True):
    """x: (N, C, H, W) float32. Returns same shape/dtype."""
    if not training:
        return x

    N, C, H, W = x.shape
    R, L = N * C, H * W

    # Pad the 2-D view so tiles are (8,128)-aligned and lane-dense.
    Rp = _round_up(R, 8)
    Lp = _round_up(L, 128)
    tr = _pick_tile(Rp, (256, 128, 64, 32, 16, 8))   # sublane tile
    tl = _pick_tile(Lp, (512, 384, 256, 128))        # lane tile (multiple of 128)
    grid = (Rp // tr, Lp // tl)

    k_mode, k_elem, k_chan = jax.random.split(key, 3)
    # emulates `random.random() < 0.5` branch choice of the torch module
    mode = jax.random.bernoulli(k_mode, 0.5).astype(jnp.int32).reshape(1)

    # Raw 32-bit random words, reinterpreted as signed int32 (free bitcast).
    ebits = lax.bitcast_convert_type(
        jax.random.bits(k_elem, (Rp, Lp), jnp.uint32), jnp.int32)
    # One word per (batch, channel) row -> block-invariant channel decision.
    cbits = lax.bitcast_convert_type(
        jax.random.bits(k_chan, (Rp, 1), jnp.uint32), jnp.int32)

    x2 = x.reshape(R, L)
    if (Rp, Lp) != (R, L):
        x2 = jnp.pad(x2, ((0, Rp - R), (0, Lp - L)))

    out2 = pl.pallas_call(
        _mixdropout_kernel,
        out_shape=jax.ShapeDtypeStruct((Rp, Lp), x.dtype),
        grid_spec=pltpu.PrefetchScalarGridSpec(
            num_scalar_prefetch=1,                      # `mode` lands in SMEM
            grid=grid,
            in_specs=[
                pl.BlockSpec((tr, tl), lambda i, j, mode: (i, j)),   # x
                pl.BlockSpec((tr, tl), lambda i, j, mode: (i, j)),   # element bits
                pl.BlockSpec((tr, 1),  lambda i, j, mode: (i, 0)),   # channel bits (per row)
            ],
            out_specs=pl.BlockSpec((tr, tl), lambda i, j, mode: (i, j)),
        ),
        compiler_params=pltpu.CompilerParams(
            dimension_semantics=("parallel", "parallel")),
    )(mode, x2, ebits, cbits)

    return out2[:R, :L].reshape(N, C, H, W)


if __name__ == "__main__":
    key = jax.random.PRNGKey(0)
    kx, kd = jax.random.split(key)

    # small NCHW input consistent with a conv-net feature map
    x = jax.random.normal(kx, (2, 4, 16, 16), dtype=jnp.float32)

    y = mix_dropout(x, kd, training=True)
    jax.block_until_ready(y)

    assert y.shape == x.shape and y.dtype == x.dtype
    # Every output element must be 0 (dropped) or x scaled by one of the two
    # inverse-keep factors (1/0.6 element-wise, 1/0.8 channel-wise).
    ok = (
        jnp.isclose(y, 0.0, atol=1e-6)
        | jnp.isclose(y, x * _SCALE_ELEM, rtol=1e-5, atol=1e-6)
        | jnp.isclose(y, x * _SCALE_CHAN, rtol=1e-5, atol=1e-6)
    )
    assert bool(jnp.all(ok))

    print("KERNEL_OK")
</pallas_src>

<mosaic_0001>
module attributes {stable_mosaic.version = 11 : i64} {
  func.func @_mixdropout_kernel(%arg0: i32, %arg1: i32, %arg2: memref<1xi32, #tpu.memory_space<smem>>, %arg3: memref<8x256xf32, #tpu.memory_space<vmem>>, %arg4: memref<8x256xi32, #tpu.memory_space<vmem>>, %arg5: memref<8x1xi32, #tpu.memory_space<vmem>>, %arg6: memref<8x256xf32, #tpu.memory_space<vmem>>) attributes {dimension_semantics = [#tpu.dimension_semantics<parallel>, #tpu.dimension_semantics<parallel>], iteration_bounds = array<i64: 1, 1>, scalar_prefetch = 1 : i64, scratch_operands = 0 : i64, tpu.core_type = #tpu.core_type<tc>, window_params = [{transform_indices = @transform_0, window_bounds = array<i64: 8, 256>}, {transform_indices = @transform_1, window_bounds = array<i64: 8, 256>}, {transform_indices = @transform_2, window_bounds = array<i64: 8, 1>}, {transform_indices = @transform_3, window_bounds = array<i64: 8, 256>}]} {
    %c0 = arith.constant 0 : index
    %0 = memref.load %arg2[%c0] : memref<1xi32, #tpu.memory_space<smem>>
    %c0_i32 = arith.constant 0 : i32
    %1 = arith.cmpi eq, %0, %c0_i32 : i32
    %2 = arith.extui %1 : i1 to i32
    %c0_i32_0 = arith.constant 0 : i32
    %3 = arith.cmpi ne, %2, %c0_i32_0 : i32
    scf.if %3 {
      %c0_3 = arith.constant 0 : index
      %c0_4 = arith.constant 0 : index
      %7 = vector.load %arg4[%c0_3, %c0_4] : memref<8x256xi32, #tpu.memory_space<vmem>>, vector<8x256xi32>
      %c-429496730_i32 = arith.constant -429496730 : i32
      %8 = vector.broadcast %c-429496730_i32 : i32 to vector<8x256xi32>
      %9 = arith.cmpi sge, %7, %8 : vector<8x256xi32>
      %c0_5 = arith.constant 0 : index
      %c0_6 = arith.constant 0 : index
      %10 = vector.load %arg3[%c0_5, %c0_6] : memref<8x256xf32, #tpu.memory_space<vmem>>, vector<8x256xf32>
      %cst = arith.constant 1.66666663 : f32
      %11 = vector.broadcast %cst : f32 to vector<8x256xf32>
      %12 = arith.mulf %10, %11 : vector<8x256xf32>
      %cst_7 = arith.constant 0.000000e+00 : f32
      %13 = vector.broadcast %cst_7 : f32 to vector<8x256xf32>
      %14 = arith.select %9, %12, %13 : vector<8x256xi1>, vector<8x256xf32>
      %c0_8 = arith.constant 0 : index
      %c0_9 = arith.constant 0 : index
      %15 = vector.load %arg6[%c0_8, %c0_9] : memref<8x256xf32, #tpu.memory_space<vmem>>, vector<8x256xf32>
      tpu.vector_store %arg6[%c0_8, %c0_9], %14 {strides = array<i32>} : memref<8x256xf32, #tpu.memory_space<vmem>>, vector<8x256xf32>,
    } else {
    }
    %c0_i32_1 = arith.constant 0 : i32
    %4 = arith.cmpi ne, %0, %c0_i32_1 : i32
    %5 = arith.extui %4 : i1 to i32
    %c0_i32_2 = arith.constant 0 : i32
    %6 = arith.cmpi ne, %5, %c0_i32_2 : i32
    scf.if %6 {
      %c0_3 = arith.constant 0 : index
      %c0_4 = arith.constant 0 : index
      %7 = vector.load %arg5[%c0_3, %c0_4] : memref<8x1xi32, #tpu.memory_space<vmem>>, vector<8x1xi32>
      %c-1288490189_i32 = arith.constant -1288490189 : i32
      %8 = vector.broadcast %c-1288490189_i32 : i32 to vector<8x1xi32>
      %9 = arith.cmpi sge, %7, %8 : vector<8x1xi32>
      %c0_5 = arith.constant 0 : index
      %c0_6 = arith.constant 0 : index
      %10 = vector.load %arg3[%c0_5, %c0_6] : memref<8x256xf32, #tpu.memory_space<vmem>>, vector<8x256xf32>
      %cst = arith.constant 1.250000e+00 : f32
      %11 = vector.broadcast %cst : f32 to vector<8x256xf32>
      %12 = arith.mulf %10, %11 : vector<8x256xf32>
      %cst_7 = arith.constant 0.000000e+00 : f32
      %13 = vector.shape_cast %9 : vector<8x1xi1> to vector<8x1xi1>
      %14 = vector.broadcast %13 : vector<8x1xi1> to vector<8x256xi1>
      %15 = vector.broadcast %cst_7 : f32 to vector<8x256xf32>
      %16 = arith.select %14, %12, %15 : vector<8x256xi1>, vector<8x256xf32>
      %c0_8 = arith.constant 0 : index
      %c0_9 = arith.constant 0 : index
      %17 = vector.load %arg6[%c0_8, %c0_9] : memref<8x256xf32, #tpu.memory_space<vmem>>, vector<8x256xf32>
      tpu.vector_store %arg6[%c0_8, %c0_9], %16 {strides = array<i32>} : memref<8x256xf32, #tpu.memory_space<vmem>>, vector<8x256xf32>,
    } else {
    }
    return
  }
  func.func @transform_0(%arg0: i32, %arg1: i32, %arg2: memref<1xi32, #tpu.memory_space<smem>>) -> (i32, i32) {
    %c0_i32 = arith.constant 0 : i32
    return %arg0, %arg1 : i32, i32
  }
  func.func @transform_1(%arg0: i32, %arg1: i32, %arg2: memref<1xi32, #tpu.memory_space<smem>>) -> (i32, i32) {
    %c0_i32 = arith.constant 0 : i32
    return %arg0, %arg1 : i32, i32
  }
  func.func @transform_2(%arg0: i32, %arg1: i32, %arg2: memref<1xi32, #tpu.memory_space<smem>>) -> (i32, i32) {
    %c0_i32 = arith.constant 0 : i32
    %c0_i32_0 = arith.constant 0 : i32
    return %arg0, %c0_i32 : i32, i32
  }
  func.func @transform_3(%arg0: i32, %arg1: i32, %arg2: memref<1xi32, #tpu.memory_space<smem>>) -> (i32, i32) {
    %c0_i32 = arith.constant 0 : i32
    return %arg0, %arg1 : i32, i32
  }
}

</mosaic_0001>

<bundles_post_ra>
// kernel: tpu_custom_call.1
= control target key start
LH: loop header
LB: loop body
LE: loop exit
PB: predicated region body
PF: predicated region fallthrough
CT: control target
= control target key end

     0   :  { %10 = vsyncpa [#allocation5], 0  ;;  %s201_s0 = inlined_call_operand.<no memory space> [shape: s32[1], index: 0, kind: input, shape index: {}]   ;;  %s202_s1 = inlined_call_operand.hbm [shape: f32[8,256], index: 1, kind: input, shape index: {}]   ;;  %s203_s2 = inlined_call_operand.vmem [shape: s32[8,256], index: 2, kind: input, shape index: {}]   ;;  %s204_s3 = inlined_call_operand.vmem [shape: s32[8,1], index: 3, kind: input, shape index: {}]   ;;  %s205_s4 = inlined_call_operand.hbm [shape: f32[8,256], index: 4, kind: output, shape index: {}]  }
   0x1   :  { %11 = vsyncpa [#allocation6], 0  ;;  %s134_s15 = smov [#allocation4]   ;;  %s86_s19 = scalar_lea.hbm %s202_s1, 256 }
   0x2   :  { %s18_s16 = sshll.u32 %s134_s15, 4  ;;  %p87_p0 = scmp.ne.s32.totalorder %s202_s1, %s86_s19  ;;  %s19_s16 = int_to_ptr.vmem [resolvable:$true] %s18_s16 }
   0x3   :  { %p90_p1 = scmp.lt.u32.totalorder %s86_s19, %s202_s1 }
   0x5   :  { %p92_p2 = pnand %p90_p1, %p87_p0 }
   0x7   :  { %95 = shalt.err (!%p92_p2)
}
   0x8   :  { %s96_s24 = scalar_lea.vmem %s19_s16, 256  ;;  %p101_p4 = scmp.lt.s32.totalorder %s19_s16, %s19_s16 }
   0x9   :  { %p97_p3 = scmp.ne.s32.totalorder %s19_s16, %s96_s24  ;;  %p102_p5 = scmp.lt.s32.totalorder %s96_s24, %s96_s24 }
   0xb   :  { %p103_p6 = por %p102_p5, %p101_p4 }
   0xd   :  { %p104_p7 = pnand %p103_p6, %p97_p3 }
   0xf   :  { %107 = shalt.err (!%p104_p7)
}
  0x10   :  { %21 = dma.hbm_to_vmem [thread:$0]  %s202_s1, 256, %s19_s16, [#allocation5]  }
  0x11   :  { %130 = dma.done.wait [#allocation5], 256  }
  0x12   :  { %131 = vsyncadd [#allocation5], 4294967040  ;;  %p80_p8 = scmp.ne.s32.totalorder %s201_s0, 0 }
  0x13   :  { %v34_v0 = vld [vmem:[%s203_s2] sm:$0xff] (!%p80_p8)  ;;  %v35_v2 = vld [vmem:[%s203_s2 + $0x8] sm:$0xff] (!%p80_p8) }
  0x14   :  { %33 = sbr.rel (%p80_p8) target bundleno = 27 (0x1b), region = 21  ;;  %v38_v1 = vld [vmem:[#allocation4] sm:$0xff] (!%p80_p8)  ;;  %vm36_vm0 = vcmp.ge.s32.totalorder (!%p80_p8), %v34_v0, 3865470566  ;;  %vm37_vm1 = vcmp.ge.s32.totalorder (!%p80_p8), %v35_v2, 3865470566 }
  0x15   :  { %v40_v3 = vmul.f32 (!%p80_p8), 1.6666666, %v38_v1  ;;  %v39_v4 = vld [vmem:[#allocation4 + $0x8] sm:$0xff] (!%p80_p8) }
  0x16   :  { %v41_v6 = vmul.f32 (!%p80_p8), 1.6666666, %v39_v4 }
  0x17   :  { %v42_v5 = vsel (!%p80_p8), %vm36_vm0, %v40_v3, 0.0 }
  0x18   :  { %44 = vst [vmem:[#allocation7] sm:$0xff] (!%p80_p8), %v42_v5  ;;  %v43_v7 = vsel (!%p80_p8), %vm37_vm1, %v41_v6, 0.0 }
  0x19   :  { %45 = vst [vmem:[#allocation7 + $0x8] sm:$0xff] (!%p80_p8), %v43_v7 }
  0x1b PF:  { %p81_p9 = scmp.eq.s32.totalorder %s201_s0, 0 }
  0x1c   :  { %v50_v8 = vld [vmem:[%s204_s3] sm:$0xff] (!%p81_p9)  ;;  %v135_v9 = vmov (!%p81_p9), 0   ;;  %v53_v12 = vld [vmem:[#allocation4 + $0x8] sm:$0xff] (!%p81_p9) }
  0x1d   :  { %49 = sbr.rel (%p81_p9) target bundleno = 162 (0xa2), region = 25  ;;  %85 = vset.pattern.permute.xlu0 (!%p81_p9), %v135_v9  ;;  %vm51_vm2 = vcmp.ge.s32.totalorder (!%p81_p9), %v50_v8, 3006477107  ;;  %v52_v11 = vld [vmem:[#allocation4] sm:$0xff] (!%p81_p9)  ;;  %v55_v14 = vmul.f32 (!%p81_p9), 1.25, %v53_v12 }
  0x1e   :  { %v56_v10 = vsel (!%p81_p9), %vm51_vm2, 1, %v135_v9  ;;  %v54_v13 = vmul.f32 (!%p81_p9), 1.25, %v52_v11 }
  0x1f   :  { %58 = vperm.xlu0 (!%p81_p9), %85, %v56_v10  }
  0x9e   :  { %v59_v15 = vpop.permute.xlu0 %58 }
  0x9f   :  { %vm60_vm3 = vcmp.eq.s32.totalorder %v59_v15, 1 }
  0xa0   :  { %v61_v16 = vsel %vm60_vm3, %v54_v13, 0.0  ;;  %v62_v17 = vsel %vm60_vm3, %v55_v14, 0.0 }
  0xa1   :  { %63 = vst [vmem:[#allocation7] sm:$0xff] %v61_v16  ;;  %64 = vst [vmem:[#allocation7 + $0x8] sm:$0xff] %v62_v17 }
  0xa2 PF:  { %s136_s0 = smov [#allocation7]  }
  0xa3   :  { %s71_s2 = sshll.u32 %s136_s0, 4  ;;  %s72_s2 = int_to_ptr.vmem [resolvable:$true] %s71_s2 }
  0xa4   :  { %s108_s3 = scalar_lea.vmem %s72_s2, 256  ;;  %p113_p11 = scmp.lt.s32.totalorder %s72_s2, %s72_s2 }
  0xa5   :  { %p109_p10 = scmp.ne.s32.totalorder %s72_s2, %s108_s3  ;;  %p114_p12 = scmp.lt.s32.totalorder %s108_s3, %s108_s3 }
  0xa7   :  { %p115_p13 = por %p114_p12, %p113_p11 }
  0xa9   :  { %p116_p0 = pnand %p115_p13, %p109_p10 }
  0xab   :  { %119 = shalt.err (!%p116_p0)
}
  0xac   :  { %s120_s12 = scalar_lea.hbm %s205_s4, 256 }
  0xad   :  { %p121_p1 = scmp.ne.s32.totalorder %s205_s4, %s120_s12  ;;  %p124_p2 = scmp.lt.u32.totalorder %s120_s12, %s205_s4 }
  0xaf   :  { %p126_p3 = pnand %p124_p2, %p121_p1 }
  0xb1   :  { %129 = shalt.err (!%p126_p3)
}
  0xb2   :  { %74 = dma.vmem_to_hbm [thread:$0]  %s72_s2, 256, %s205_s4, [#allocation6]  }
  0xb3   :  { %132 = dma.done.wait [#allocation6], 256  }
  0xb4   :  { %133 = vsyncadd [#allocation6], 4294967040 }
  0xb5   :  { %78 = vsyncpa [#allocation5], 1 }
  0xb6   :  { %79 = vsyncpa [#allocation6], 1 }

</bundles_post_ra>
